<compile_context>
chip_gen: v5e
topology: v5e:2x2
jax: 0.10.0
libtpu: 0.0.40
codegen_flags: <defaults>
</compile_context>

<pallas_src>
import jax
import jax.numpy as jnp
from jax.experimental import pallas as pl
from jax.experimental.pallas import tpu as pltpu


def _round_up(x: int, m: int) -> int:
    return (x + m - 1) // m * m


def _embed_onehot_kernel(idx_ref, emb_ref, out_ref):
    # idx_ref: (TM, 1) int32 block of indices (VMEM)
    # emb_ref: (V_pad, D_pad) full embedding table (VMEM-resident, constant block)
    # out_ref: (TM, D_pad) gathered rows
    tm = idx_ref.shape[0]
    v_pad = emb_ref.shape[0]
    idx = idx_ref[...]                                            # (TM, 1)
    cols = jax.lax.broadcasted_iota(jnp.int32, (tm, v_pad), 1)    # (TM, V_pad)
    onehot = (cols == idx).astype(emb_ref.dtype)                  # exact 0/1 rows
    out_ref[...] = jnp.dot(
        onehot, emb_ref[...], preferred_element_type=jnp.float32
    ).astype(out_ref.dtype)


def embedding_lookup(embedding: jax.Array, x: jax.Array, *, block_rows: int = 256) -> jax.Array:
    """Pallas equivalent of `embedding[x]`.

    embedding: (num_items, D) float table.
    x:         integer indices of arbitrary shape.
    returns:   x.shape + (D,) array of gathered rows.
    """
    num_items, d = embedding.shape
    orig_shape = x.shape
    idx_flat = x.reshape(-1).astype(jnp.int32)
    n = idx_flat.shape[0]

    # Lane/sublane friendly padding.
    d_pad = _round_up(d, 128)            # lane axis of table / output
    v_pad = _round_up(num_items, 128)    # lane axis of the one-hot, MXU-friendly

    # Rows per grid step: multiple of 8 (sublane-dense stores), capped at block_rows.
    tm = min(block_rows, _round_up(max(n, 1), 8))
    n_pad = _round_up(max(n, 1), tm)

    emb_p = jnp.pad(embedding, ((0, v_pad - num_items), (0, d_pad - d)))
    idx_p = jnp.pad(idx_flat, (0, n_pad - n)).reshape(n_pad, 1)

    grid = (n_pad // tm,)

    itemsize = jnp.dtype(embedding.dtype).itemsize
    table_bytes = v_pad * d_pad * itemsize
    block_bytes = tm * (d_pad * itemsize + 4)
    vmem_limit = max(16 << 20, min(table_bytes + 8 * block_bytes + (2 << 20), 64 << 20))

    cost = pl.CostEstimate(
        flops=2 * n_pad * v_pad * d_pad,
        transcendentals=0,
        bytes_accessed=table_bytes + n_pad * 4 + n_pad * d_pad * itemsize,
    )

    out = pl.pallas_call(
        _embed_onehot_kernel,
        out_shape=jax.ShapeDtypeStruct((n_pad, d_pad), embedding.dtype),
        grid_spec=pltpu.PrefetchScalarGridSpec(
            num_scalar_prefetch=0,
            grid=grid,
            in_specs=[
                # TM indices per step, sublane-dense.
                pl.BlockSpec((tm, 1), lambda i: (i, 0)),
                # Whole table as a single constant block -> fetched once, stays in VMEM.
                pl.BlockSpec((v_pad, d_pad), lambda i: (0, 0)),
            ],
            out_specs=pl.BlockSpec((tm, d_pad), lambda i: (i, 0)),
        ),
        compiler_params=pltpu.CompilerParams(
            dimension_semantics=("parallel",),   # independent steps -> both TCs on v7x
            vmem_limit_bytes=int(vmem_limit),
        ),
        cost_estimate=cost,
    )(idx_p, emb_p)

    return out[:n, :d].reshape(*orig_shape, d)


if __name__ == "__main__":
    # Module config (small, lane-friendly shapes), mirroring nn.Parameter(torch.randn(V, D)).
    num_items = 64
    embedding_dim = 128

    key = jax.random.PRNGKey(0)
    k_emb, k_idx = jax.random.split(key)

    embedding = jax.random.normal(k_emb, (num_items, embedding_dim), dtype=jnp.float32)

    # Example input: batch of index sequences, shape (2, 8).
    x = jax.random.randint(k_idx, (2, 8), minval=0, maxval=num_items, dtype=jnp.int32)

    y = embedding_lookup(embedding, x)
    y = jax.block_until_ready(y)

    # Correctness check against plain JAX gather (== torch embedding[x]).
    y_ref = embedding[x]
    assert y.shape == (2, 8, embedding_dim)
    assert jnp.allclose(y, y_ref), "Pallas embedding gather mismatch"

    print("KERNEL_OK")
</pallas_src>

<mosaic_0001>
module attributes {stable_mosaic.version = 11 : i64} {
  func.func @_embed_onehot_kernel(%arg0: i32, %arg1: memref<16x1xi32, #tpu.memory_space<vmem>>, %arg2: memref<128x128xf32, #tpu.memory_space<vmem>>, %arg3: memref<16x128xf32, #tpu.memory_space<vmem>>) attributes {dimension_semantics = [#tpu.dimension_semantics<parallel>], iteration_bounds = array<i64: 1>, scalar_prefetch = 0 : i64, scratch_operands = 0 : i64, tpu.core_type = #tpu.core_type<tc>, window_params = [{transform_indices = @transform_0, window_bounds = array<i64: 16, 1>}, {pipeline_mode = #tpu.pipeline_mode<synchronous>, transform_indices = @transform_1, window_bounds = array<i64: 128, 128>}, {transform_indices = @transform_2, window_bounds = array<i64: 16, 128>}]} {
    %c0 = arith.constant 0 : index
    %c0_0 = arith.constant 0 : index
    %0 = vector.load %arg1[%c0, %c0_0] : memref<16x1xi32, #tpu.memory_space<vmem>>, vector<16x1xi32>
    %1 = tpu.iota {dimensions = array<i32: 1>} : vector<16x128xi32>
    %2 = vector.broadcast %0 : vector<16x1xi32> to vector<16x128xi32>
    %3 = arith.cmpi eq, %1, %2 : vector<16x128xi32>
    %4 = arith.extui %3 : vector<16x128xi1> to vector<16x128xi32>
    %5 = arith.sitofp %4 : vector<16x128xi32> to vector<16x128xf32>
    %c0_1 = arith.constant 0 : index
    %c0_2 = arith.constant 0 : index
    %6 = vector.load %arg2[%c0_1, %c0_2] : memref<128x128xf32, #tpu.memory_space<vmem>>, vector<128x128xf32>
    %cst = arith.constant dense<0.000000e+00> : vector<16x128xf32>
    %7 = tpu.matmul %5, %6, %cst {dimension_numbers = #tpu.dot_dimension_numbers<[1], [0], [0], [1], [0, 0, 1, 1], [], []>} : vector<16x128xf32>, vector<128x128xf32>, vector<16x128xf32> -> vector<16x128xf32>
    %c0_3 = arith.constant 0 : index
    %c0_4 = arith.constant 0 : index
    %8 = vector.load %arg3[%c0_3, %c0_4] : memref<16x128xf32, #tpu.memory_space<vmem>>, vector<16x128xf32>
    tpu.vector_store %arg3[%c0_3, %c0_4], %7 {strides = array<i32>} : memref<16x128xf32, #tpu.memory_space<vmem>>, vector<16x128xf32>,
    return
  }
  func.func @transform_0(%arg0: i32) -> (i32, i32) {
    %c0_i32 = arith.constant 0 : i32
    %c0_i32_0 = arith.constant 0 : i32
    return %arg0, %c0_i32 : i32, i32
  }
  func.func @transform_1(%arg0: i32) -> (i32, i32) {
    %c0_i32 = arith.constant 0 : i32
    %c0_i32_0 = arith.constant 0 : i32
    %c0_i32_1 = arith.constant 0 : i32
    return %c0_i32, %c0_i32_0 : i32, i32
  }
  func.func @transform_2(%arg0: i32) -> (i32, i32) {
    %c0_i32 = arith.constant 0 : i32
    %c0_i32_0 = arith.constant 0 : i32
    return %arg0, %c0_i32 : i32, i32
  }
}

</mosaic_0001>

<bundles_post_ra>
// kernel: tpu_custom_call.1
= control target key start
LH: loop header
LB: loop body
LE: loop exit
PB: predicated region body
PF: predicated region fallthrough
CT: control target
= control target key end

     0   :  { %7 = vsyncpa [#allocation3], 0  ;;  %s222_s0 = inlined_call_operand.vmem [shape: s32[16,1], index: 0, kind: input, shape index: {}]   ;;  %s223_s1 = inlined_call_operand.hbm [shape: f32[128,128], index: 1, kind: input, shape index: {}]   ;;  %s224_s2 = inlined_call_operand.hbm [shape: f32[16,128], index: 2, kind: output, shape index: {}]  }
   0x1   :  { %8 = vsyncpa [#allocation4], 0  ;;  %s15_s11 = sshll.u32 %s223_s1, 4  ;;  %s183_s12 = smov [#allocation2]   ;;  %s16_s11 = int_to_ptr.hbm [resolvable:$true] %s15_s11 }
   0x2   :  { %s17_s13 = sshll.u32 %s183_s12, 4  ;;  %s184_s14 = smov 128   ;;  %s18_s13 = int_to_ptr.vmem [resolvable:$true] %s17_s13 }
   0x3   :  { %s185_s15 = smov 8  }
   0x4   :  { %23 = dma.hbm_to_vmem [thread:$0]  %s16_s11, 2048, %s18_s13, [#allocation3], %s184_s14, %s184_s14, %s185_s15  }
   0x5   :  { %179 = dma.done.wait [#allocation3], 2048  }
   0x6   :  { %180 = vsyncadd [#allocation3], 4294965248  ;;  %v186_v0 = vmov 0   ;;  %v28_v1 = vld [vmem:[%s222_s0] sm:$0xff]  ;;  %v59_v2 = vld [vmem:[#allocation2 + $0x78] sm:$0xff]  ;;  %v30_v19 = vlaneseq  ;;  %v187_v22 = vmov 1.0  }
   0x7   :  { %130 = vset.pattern.permute.xlu0 %v186_v0  ;;  %60 = vmatpush.msra.mxu0 %v59_v2  ;;  %v58_v3 = vld [vmem:[#allocation2 + $0x70] sm:$0xff]  ;;  %v57_v4 = vld [vmem:[#allocation2 + $0x68] sm:$0xff]  ;;  %v56_v5 = vld [vmem:[#allocation2 + $0x60] sm:$0xff]  ;;  %s91_s22 = sshll.u32 %s224_s2, 4  ;;  %s92_s22 = int_to_ptr.hbm [resolvable:$true] %s91_s22 }
   0x8   :  { %33 = vperm.xlu0 %130, %v28_v1   ;;  %108 = vmatpush.msra.mxu1 %v59_v2  ;;  %v29_v6 = vld [vmem:[%s222_s0 + $0x8] sm:$0xff]  ;;  %v55_v7 = vld [vmem:[#allocation2 + $0x58] sm:$0xff]  ;;  %v54_v8 = vld [vmem:[#allocation2 + $0x50] sm:$0xff]  ;;  %v31_v20 = vand.u32 127, %v30_v19  ;;  %s188_s0 = smov [#allocation5]  }
   0x9   :  { %61 = vmatpush.msra.mxu0 %v58_v3  ;;  %v53_v9 = vld [vmem:[#allocation2 + $0x48] sm:$0xff]  ;;  %v52_v10 = vld [vmem:[#allocation2 + $0x40] sm:$0xff]  ;;  %v51_v11 = vld [vmem:[#allocation2 + $0x38] sm:$0xff]  ;;  %s89_s19 = sshll.u32 %s188_s0, 4  ;;  %s90_s19 = int_to_ptr.vmem [resolvable:$true] %s89_s19 }
   0xa   :  { %109 = vmatpush.msra.mxu1 %v58_v3  ;;  %v50_v12 = vld [vmem:[#allocation2 + $0x30] sm:$0xff]  ;;  %v49_v13 = vld [vmem:[#allocation2 + $0x28] sm:$0xff]  ;;  %v48_v14 = vld [vmem:[#allocation2 + $0x20] sm:$0xff] }
   0xb   :  { %62 = vmatpush.msra.mxu0 %v57_v4  ;;  %v47_v15 = vld [vmem:[#allocation2 + $0x18] sm:$0xff]  ;;  %v46_v16 = vld [vmem:[#allocation2 + $0x10] sm:$0xff]  ;;  %v45_v17 = vld [vmem:[#allocation2 + $0x8] sm:$0xff] }
   0xc   :  { %110 = vmatpush.msra.mxu1 %v57_v4  ;;  %v44_v18 = vld [vmem:[#allocation2] sm:$0xff] }
   0xd   :  { %63 = vmatpush.msra.mxu0 %v56_v5 }
   0xe   :  { %111 = vmatpush.msra.mxu1 %v56_v5 }
   0xf   :  { %64 = vmatpush.msra.mxu0 %v55_v7 }
  0x10   :  { %36 = vperm.xlu0 %130, %v29_v6   ;;  %112 = vmatpush.msra.mxu1 %v55_v7 }
  0x11   :  { %65 = vmatpush.msra.mxu0 %v54_v8 }
  0x12   :  { %113 = vmatpush.msra.mxu1 %v54_v8 }
  0x13   :  { %66 = vmatpush.msra.mxu0 %v53_v9 }
  0x14   :  { %114 = vmatpush.msra.mxu1 %v53_v9 }
  0x15   :  { %67 = vmatpush.msra.mxu0 %v52_v10 }
  0x16   :  { %115 = vmatpush.msra.mxu1 %v52_v10 }
  0x17   :  { %68 = vmatpush.msra.mxu0 %v51_v11 }
  0x18   :  { %116 = vmatpush.msra.mxu1 %v51_v11 }
  0x19   :  { %69 = vmatpush.msra.mxu0 %v50_v12 }
  0x1a   :  { %117 = vmatpush.msra.mxu1 %v50_v12 }
  0x1b   :  { %70 = vmatpush.msra.mxu0 %v49_v13 }
  0x1c   :  { %118 = vmatpush.msra.mxu1 %v49_v13 }
  0x1d   :  { %71 = vmatpush.msra.mxu0 %v48_v14 }
  0x1e   :  { %119 = vmatpush.msra.mxu1 %v48_v14 }
  0x1f   :  { %72 = vmatpush.msra.mxu0 %v47_v15 }
  0x20   :  { %120 = vmatpush.msra.mxu1 %v47_v15 }
  0x21   :  { %73 = vmatpush.msra.mxu0 %v46_v16 }
  0x22   :  { %121 = vmatpush.msra.mxu1 %v46_v16 }
  0x23   :  { %74 = vmatpush.msra.mxu0 %v45_v17 }
  0x24   :  { %122 = vmatpush.msra.mxu1 %v45_v17 }
  0x25   :  { %75 = vmatpush.msra.mxu0 %v44_v18 }
  0x26   :  { %123 = vmatpush.msra.mxu1 %v44_v18 }
  0x7a   :  { %v34_v21 = vpop.permute.xlu0 %33 }
  0x7b   :  { %vm38_vm0 = vcmp.eq.s32.totalorder %v31_v20, %v34_v21 }
  0x7c   :  { %106 = vmatmul.msk.f32.vlgmr.msra.gmra.mxu0 %vm38_vm0, %v187_v22 }
  0x82   :  { %v37_v23 = vpop.permute.xlu0 %36 }
  0x83   :  { %vm39_vm1 = vcmp.eq.s32.totalorder %v31_v20, %v37_v23 }
  0x84   :  { %107 = vmatmul.msk.f32.vlgmr.msra.gmra.mxu1 %vm39_vm1, %v187_v22 }
  0xf9   :  { %v77_v24 = vpop.f32.mrf.mxu0 }
  0xfa   :  { %83 = vst [vmem:[#allocation5] sm:$0xff] %v77_v24 }
 0x101   :  { %v80_v25 = vpop.f32.mrf.mxu1 }
 0x102   :  { %84 = vst [vmem:[#allocation5 + $0x8] sm:$0xff] %v80_v25 }
 0x103   :  { %97 = dma.vmem_to_hbm [thread:$0]  %s90_s19, 256, %s92_s22, [#allocation4], %s184_s14, %s184_s14, %s185_s15  }
 0x104   :  { %181 = dma.done.wait [#allocation4], 256  }
 0x105   :  { %182 = vsyncadd [#allocation4], 4294967040 }
 0x106   :  { %102 = vsyncpa [#allocation3], 1 }
 0x107   :  { %103 = vsyncpa [#allocation4], 1 }

</bundles_post_ra>
